<compile_context>
chip_gen: v6e
topology: v6e:2x2x1
jax: 0.10.0
libtpu: 0.0.40
codegen_flags: <defaults>
</compile_context>

<pallas_src>
import functools

import numpy as np
import jax
import jax.numpy as jnp
from jax.experimental import pallas as pl
from jax.experimental.pallas import tpu as pltpu


def _round_up(x, m):
    return (x + m - 1) // m * m


def _pick_div(total, cap, mult):
    """Largest multiple of `mult` that divides `total` and is <= cap."""
    best = mult
    d = mult
    lim = min(total, cap)
    while d <= lim:
        if total % d == 0:
            best = d
        d += mult
    return best


def _pick_div_or_none(total, cap, mult):
    best = None
    d = mult
    lim = min(total, cap)
    while d <= lim:
        if total % d == 0:
            best = d
        d += mult
    return best


# --------------------------------------------------------------------------
# Pallas kernels
# --------------------------------------------------------------------------
def _mm_fused_kernel(*refs, relu, has_scale, has_bias, has_res):
    """Tiled matmul + optional BN scale/shift + residual add + ReLU."""
    a_ref, b_ref = refs[0], refs[1]
    idx = 2
    s_ref = bi_ref = r_ref = None
    if has_scale:
        s_ref = refs[idx]; idx += 1
    if has_bias:
        bi_ref = refs[idx]; idx += 1
    if has_res:
        r_ref = refs[idx]; idx += 1
    o_ref, acc_ref = refs[idx], refs[idx + 1]

    @pl.when(pl.program_id(2) == 0)
    def _():
        acc_ref[...] = jnp.zeros_like(acc_ref)

    acc_ref[...] += jnp.dot(a_ref[...], b_ref[...],
                            preferred_element_type=jnp.float32)

    @pl.when(pl.program_id(2) == pl.num_programs(2) - 1)
    def _():
        y = acc_ref[...]
        if has_scale:
            y = y * s_ref[...]
        if has_bias:
            y = y + bi_ref[...]
        if has_res:
            y = y + r_ref[...].astype(jnp.float32)
        if relu:
            y = jnp.maximum(y, 0.0)
        o_ref[...] = y.astype(o_ref.dtype)


def matmul_fused(a, b, scale=None, bias=None, relu=False, residual=None,
                 out_dtype=None):
    """out = act((a @ b) [*scale] [+bias] [+residual]); M never padded to tiles."""
    M, K = a.shape
    K2, N = b.shape
    assert K == K2
    out_dtype = out_dtype if out_dtype is not None else a.dtype

    Kp = _round_up(K, 128)
    Np = _round_up(N, 128)
    M8 = _round_up(M, 8)          # sublane alignment only (<= 7 extra rows)
    tk = _pick_div(Kp, 1024, 128)
    tn = _pick_div(Np, 512, 128)
    tm = min(512, M8)

    a_p = a
    if Kp != K or M8 != M:
        a_p = jnp.pad(a, ((0, M8 - M), (0, Kp - K)))
    b_p = b
    if Kp != K or Np != N:
        b_p = jnp.pad(b, ((0, Kp - K), (0, Np - N)))

    args = [a_p, b_p]
    in_specs = [pl.BlockSpec((tm, tk), lambda i, j, k: (i, k)),
                pl.BlockSpec((tk, tn), lambda i, j, k: (k, j))]

    has_scale = scale is not None
    has_bias = bias is not None
    has_res = residual is not None
    if has_scale:
        s_p = scale.astype(jnp.float32).reshape(1, N)
        if Np != N:
            s_p = jnp.pad(s_p, ((0, 0), (0, Np - N)))
        args.append(s_p)
        in_specs.append(pl.BlockSpec((1, tn), lambda i, j, k: (0, j)))
    if has_bias:
        c_p = bias.astype(jnp.float32).reshape(1, N)
        if Np != N:
            c_p = jnp.pad(c_p, ((0, 0), (0, Np - N)))
        args.append(c_p)
        in_specs.append(pl.BlockSpec((1, tn), lambda i, j, k: (0, j)))
    if has_res:
        r_p = residual
        if Np != N or M8 != M:
            r_p = jnp.pad(r_p, ((0, M8 - M), (0, Np - N)))
        args.append(r_p)
        in_specs.append(pl.BlockSpec((tm, tn), lambda i, j, k: (i, j)))

    out = pl.pallas_call(
        functools.partial(_mm_fused_kernel, relu=relu, has_scale=has_scale,
                          has_bias=has_bias, has_res=has_res),
        out_shape=jax.ShapeDtypeStruct((M8, Np), out_dtype),
        grid_spec=pltpu.PrefetchScalarGridSpec(
            num_scalar_prefetch=0,
            grid=(pl.cdiv(M8, tm), Np // tn, Kp // tk),
            in_specs=in_specs,
            out_specs=pl.BlockSpec((tm, tn), lambda i, j, k: (i, j)),
            scratch_shapes=[pltpu.VMEM((tm, tn), jnp.float32)]),
        compiler_params=pltpu.CompilerParams(
            dimension_semantics=("parallel", "parallel", "arbitrary")),
    )(*args)
    if M8 != M or Np != N:
        out = out[:M, :N]
    return out


def _direct_conv_kernel(*refs, tr, kw, dil, wo, relu):
    """Direct (no-im2col) stride-1 conv: reduction over (tap_row, cin_tile).

    refs = [x_row_0 .. x_row_{tr-1}, w, scale, bias, out, acc]
    Each x_row_q is a (1, 1, Wp, tc) shifted window of the padded activation;
    the kw column taps are sliced in-VMEM (static offsets kj*dil).
    """
    x_refs = refs[:tr]
    w_ref, s_ref, b_ref = refs[tr], refs[tr + 1], refs[tr + 2]
    o_ref, acc_ref = refs[tr + 3], refs[tr + 4]

    ki = pl.program_id(2)
    kc = pl.program_id(3)

    @pl.when((ki == 0) & (kc == 0))
    def _():
        acc_ref[...] = jnp.zeros_like(acc_ref)

    for kj in range(kw):
        s0 = kj * dil
        parts = [x_refs[q][0, 0, s0:s0 + wo, :] for q in range(tr)]
        a = parts[0] if tr == 1 else jnp.concatenate(parts, axis=0)
        acc_ref[...] += jnp.dot(a, w_ref[0, kj],
                                preferred_element_type=jnp.float32)

    @pl.when((ki == pl.num_programs(2) - 1) & (kc == pl.num_programs(3) - 1))
    def _():
        y = acc_ref[...] * s_ref[...] + b_ref[...]
        if relu:
            y = jnp.maximum(y, 0.0)
        o_ref[...] = y.astype(o_ref.dtype)


def conv_direct(x, w, scale, bias, dilation=1, relu=True, out_dtype=None):
    """KxK conv, stride 1, padding == dilation, fused BN + ReLU (no im2col)."""
    N, H, W_, C = x.shape
    kh, kw, cin, cout = w.shape
    assert cin == C
    pad = dilation
    out_dtype = out_dtype if out_dtype is not None else x.dtype
    Ho, Wo = H, W_
    Wp = W_ + 2 * pad
    xp = jnp.pad(x, ((0, 0), (pad, pad), (pad, pad), (0, 0)))
    R = N * Ho

    # tile sizes
    if C <= 512:
        tc = C
    else:
        tc = _pick_div(C, 512, 128) if C % 128 == 0 else C
    if cout <= 512:
        tn = cout
    else:
        tn = _pick_div(cout, 512, 128) if cout % 128 == 0 else cout

    # output rows handled per M-tile (tr single-row shifted windows each)
    target = max(1, min(32, 512 // max(Wo, 1)))
    tr = None
    for d in range(1, R + 1):
        if R % d == 0 and d <= target and (d * Wo) % 8 == 0:
            tr = d
    if tr is None:
        tr = R                      # full-extent block fallback
    TM = tr * Wo
    GM = R // tr

    def x_map(q):
        def im(m, j, ki, c):
            r = m * tr + q
            return (r // Ho, (r % Ho) + ki * dilation, 0, c)
        return im

    in_specs = [pl.BlockSpec((1, 1, Wp, tc), x_map(q)) for q in range(tr)]
    in_specs += [
        pl.BlockSpec((1, kw, tc, tn), lambda m, j, ki, c: (ki, 0, c, j)),
        pl.BlockSpec((1, tn), lambda m, j, ki, c: (0, j)),
        pl.BlockSpec((1, tn), lambda m, j, ki, c: (0, j)),
    ]
    args = [xp] * tr + [w,
                        scale.astype(jnp.float32).reshape(1, cout),
                        bias.astype(jnp.float32).reshape(1, cout)]

    out = pl.pallas_call(
        functools.partial(_direct_conv_kernel, tr=tr, kw=kw, dil=dilation,
                          wo=Wo, relu=relu),
        out_shape=jax.ShapeDtypeStruct((R * Wo, cout), out_dtype),
        grid_spec=pltpu.PrefetchScalarGridSpec(
            num_scalar_prefetch=0,
            grid=(GM, cout // tn, kh, C // tc),
            in_specs=in_specs,
            out_specs=pl.BlockSpec((TM, tn), lambda m, j, ki, c: (m, j)),
            scratch_shapes=[pltpu.VMEM((TM, tn), jnp.float32)]),
        compiler_params=pltpu.CompilerParams(
            dimension_semantics=("parallel", "parallel",
                                 "arbitrary", "arbitrary")),
    )(*args)
    return out.reshape(N, Ho, Wo, cout)


def _max_reduce_kernel(x_ref, o_ref):
    o_ref[...] = jnp.max(x_ref[...], axis=0)


def _gap_kernel(x_ref, o_ref, acc_ref, *, inv_count):
    @pl.when(pl.program_id(1) == 0)
    def _():
        acc_ref[...] = jnp.zeros_like(acc_ref)

    acc_ref[...] += jnp.sum(x_ref[0].astype(jnp.float32), axis=0,
                            keepdims=True)

    @pl.when(pl.program_id(1) == pl.num_programs(1) - 1)
    def _():
        o_ref[...] = (acc_ref[...] * inv_count)[None].astype(o_ref.dtype)


# --------------------------------------------------------------------------
# Conv / pooling / resize wrappers (thin JAX glue, compute in Pallas)
# --------------------------------------------------------------------------
def _im2col(x, kh, kw, stride, dilation, padding):
    N, H, W_, C = x.shape
    Ho = (H + 2 * padding - dilation * (kh - 1) - 1) // stride + 1
    Wo = (W_ + 2 * padding - dilation * (kw - 1) - 1) // stride + 1
    xp = jnp.pad(x, ((0, 0), (padding, padding), (padding, padding), (0, 0)))
    taps = []
    for i in range(kh):
        for j in range(kw):
            taps.append(
                xp[:, i * dilation: i * dilation + stride * (Ho - 1) + 1: stride,
                      j * dilation: j * dilation + stride * (Wo - 1) + 1: stride, :])
    patches = jnp.concatenate(taps, axis=-1)          # (N, Ho, Wo, kh*kw*C)
    return patches.reshape(N * Ho * Wo, kh * kw * C), (N, Ho, Wo)


def conv_bn_act(x, w, scale, bias, stride=1, dilation=1, padding=0, relu=True,
                residual=None, out_dtype=jnp.bfloat16):
    """x: (N,H,W,Cin) NHWC bf16.  w: (kh,kw,Cin,Cout) bf16."""
    kh, kw, cin, cout = w.shape
    if kh == 1 and kw == 1:
        if stride > 1:
            x = x[:, ::stride, ::stride, :]
        N, H, W_, C = x.shape
        r2 = (residual.reshape(N * H * W_, cout)
              if residual is not None else None)
        out = matmul_fused(x.reshape(N * H * W_, C), w.reshape(cin, cout),
                           scale=scale, bias=bias, relu=relu, residual=r2,
                           out_dtype=out_dtype)
        return out.reshape(N, H, W_, cout)
    if stride == 1 and padding == dilation and residual is None:
        return conv_direct(x, w, scale, bias, dilation=dilation, relu=relu,
                           out_dtype=out_dtype)
    # TODO(synk): the two stride-2 spatial convs (stem 7x7, layer2.0 3x3) still
    # go through im2col; all other spatial convs use the direct Pallas path.
    patches, (N, Ho, Wo) = _im2col(x, kh, kw, stride, dilation, padding)
    r2 = residual.reshape(N * Ho * Wo, cout) if residual is not None else None
    out = matmul_fused(patches, w.reshape(kh * kw * cin, cout), scale=scale,
                       bias=bias, relu=relu, residual=r2, out_dtype=out_dtype)
    return out.reshape(N, Ho, Wo, cout)


def maxpool_3x3_s2_p1(x):
    N, H, W_, C = x.shape
    k, s, p = 3, 2, 1
    Ho = (H + 2 * p - k) // s + 1
    Wo = (W_ + 2 * p - k) // s + 1
    neg = float(jnp.finfo(x.dtype).min)
    xp = jnp.pad(x, ((0, 0), (p, p), (p, p), (0, 0)), constant_values=neg)
    taps = [xp[:, i:i + s * (Ho - 1) + 1:s, j:j + s * (Wo - 1) + 1:s, :]
            for i in range(k) for j in range(k)]
    M = N * Ho * Wo
    pats = jnp.stack(taps, axis=0).reshape(k * k, M, C)
    Mp = _round_up(M, 8)
    if Mp != M:
        pats = jnp.pad(pats, ((0, 0), (0, Mp - M), (0, 0)),
                       constant_values=neg)
    mt = min(1024, Mp)
    out = pl.pallas_call(
        _max_reduce_kernel,
        out_shape=jax.ShapeDtypeStruct((Mp, C), x.dtype),
        grid_spec=pltpu.PrefetchScalarGridSpec(
            num_scalar_prefetch=0,
            grid=(pl.cdiv(Mp, mt),),
            in_specs=[pl.BlockSpec((k * k, mt, C), lambda i: (0, i, 0))],
            out_specs=pl.BlockSpec((mt, C), lambda i: (i, 0))),
        compiler_params=pltpu.CompilerParams(
            dimension_semantics=("parallel",)),
    )(pats)
    return out[:M].reshape(N, Ho, Wo, C)


def global_avg_pool(x):
    """(N,H,W,C) -> (N,1,1,C); tiled HW reduction with f32 accumulator."""
    N, H, W_, C = x.shape
    HW = H * W_
    xr = x.reshape(N, HW, C)
    if HW <= 512:
        hwt = HW
    else:
        hwt = _pick_div_or_none(HW, 512, 8)
        if hwt is None:
            HWp = _round_up(HW, 512)
            xr = jnp.pad(xr, ((0, 0), (0, HWp - HW), (0, 0)))
            hwt = 512
    HWt = xr.shape[1]
    out = pl.pallas_call(
        functools.partial(_gap_kernel, inv_count=1.0 / HW),
        out_shape=jax.ShapeDtypeStruct((N, 1, C), x.dtype),
        grid_spec=pltpu.PrefetchScalarGridSpec(
            num_scalar_prefetch=0,
            grid=(N, HWt // hwt),
            in_specs=[pl.BlockSpec((1, hwt, C), lambda n, h: (n, h, 0))],
            out_specs=pl.BlockSpec((1, 1, C), lambda n, h: (n, 0, 0)),
            scratch_shapes=[pltpu.VMEM((1, C), jnp.float32)]),
        compiler_params=pltpu.CompilerParams(
            dimension_semantics=("parallel", "arbitrary")),
    )(xr)
    return out.reshape(N, 1, 1, C)


def _interp_matrix(out_size, in_size):
    """PyTorch bilinear (align_corners=False) 1-D interpolation matrix."""
    m = np.zeros((out_size, in_size), dtype=np.float32)
    if in_size == 1:
        m[:, 0] = 1.0
        return m
    scale = in_size / out_size
    for i in range(out_size):
        src = max((i + 0.5) * scale - 0.5, 0.0)
        i0 = min(int(np.floor(src)), in_size - 1)
        i1 = min(i0 + 1, in_size - 1)
        w1 = src - i0
        m[i, i0] += 1.0 - w1
        m[i, i1] += w1
    return m


def bilinear_resize_to_nchw(y_nhwc, out_h, out_w):
    """(N,h,w,C) NHWC -> (N,C,out_h,out_w) NCHW, PyTorch bilinear
    (align_corners=False).  H pass then W pass: the full-resolution result is
    written once, lane-dense, directly in its final NCHW layout."""
    N, fh, fw, C = y_nhwc.shape
    Mh = jnp.asarray(_interp_matrix(out_h, fh))      # (out_h, fh)
    Mw = jnp.asarray(_interp_matrix(out_w, fw))      # (out_w, fw)
    t = jnp.transpose(y_nhwc, (0, 3, 2, 1)).astype(jnp.float32)   # (N,C,fw,fh)
    t = matmul_fused(t.reshape(N * C * fw, fh), Mh.T, out_dtype=jnp.float32)
    t = t.reshape(N, C, fw, out_h).transpose(0, 1, 3, 2)          # (N,C,out_h,fw)
    out = matmul_fused(t.reshape(N * C * out_h, fw), Mw.T,
                       out_dtype=jnp.float32)
    return out.reshape(N, C, out_h, out_w)


# --------------------------------------------------------------------------
# Deterministic parameter construction (synthetic init; no checkpoint load)
# --------------------------------------------------------------------------
class _Init:
    def __init__(self, key):
        self._key = key
        self._n = 0

    def key(self):
        self._n += 1
        return jax.random.fold_in(self._key, self._n)


def _conv_w(init, kh, kw, cin, cout):
    fan_in = kh * kw * cin
    w = (jax.random.normal(init.key(), (kh, kw, cin, cout), jnp.float32)
         / np.sqrt(fan_in))
    return w.astype(jnp.bfloat16)      # pre-converted once for the MXU


def _bn(init, c, eps=1e-5):
    gamma = 1.0 + 0.1 * jax.random.normal(init.key(), (c,), jnp.float32)
    beta = 0.1 * jax.random.normal(init.key(), (c,), jnp.float32)
    running_mean = jnp.zeros((c,), jnp.float32)
    running_var = jnp.ones((c,), jnp.float32)
    scale = gamma * jax.lax.rsqrt(running_var + eps)
    bias = beta - running_mean * scale
    return scale, bias


def _conv_bn(init, kh, kw, cin, cout):
    s, b = _bn(init, cout)
    return {'w': _conv_w(init, kh, kw, cin, cout), 's': s, 'b': b}


def make_params(key, num_classes=8):
    init = _Init(key)
    p = {'stem': _conv_bn(init, 7, 7, 3, 64)}
    inplanes = 64
    for name, planes, nblocks in (('layer1', 64, 3), ('layer2', 128, 4),
                                  ('layer3', 256, 6), ('layer4', 512, 3)):
        blocks = []
        for bi in range(nblocks):
            cin = inplanes if bi == 0 else planes * 4
            blk = {
                'c1': _conv_bn(init, 1, 1, cin, planes),
                'c2': _conv_bn(init, 3, 3, planes, planes),
                'c3': _conv_bn(init, 1, 1, planes, planes * 4),
            }
            if bi == 0:  # resnet50: every stage-0 block has a downsample branch
                blk['down'] = _conv_bn(init, 1, 1, cin, planes * 4)
            blocks.append(blk)
        inplanes = planes * 4
        p[name] = blocks
    p['aspp'] = {
        'b0': _conv_bn(init, 1, 1, 2048, 256),
        'b1': _conv_bn(init, 3, 3, 2048, 256),
        'b2': _conv_bn(init, 3, 3, 2048, 256),
        'b3': _conv_bn(init, 3, 3, 2048, 256),
        'pool': _conv_bn(init, 1, 1, 2048, 256),
        'proj': _conv_bn(init, 1, 1, 5 * 256, 256),
    }
    p['head'] = {
        'conv': _conv_bn(init, 3, 3, 256, 256),
        'cls_w': _conv_w(init, 1, 1, 256, num_classes),
        'cls_b': 0.1 * jax.random.normal(init.key(), (num_classes,), jnp.float32),
    }
    return p


# --------------------------------------------------------------------------
# Forward pass
# --------------------------------------------------------------------------
def _bottleneck(x, blk, stride, dilation):
    out = conv_bn_act(x, blk['c1']['w'], blk['c1']['s'], blk['c1']['b'], relu=True)
    out = conv_bn_act(out, blk['c2']['w'], blk['c2']['s'], blk['c2']['b'],
                      stride=stride, dilation=dilation, padding=dilation, relu=True)
    if 'down' in blk:
        identity = conv_bn_act(x, blk['down']['w'], blk['down']['s'],
                               blk['down']['b'], stride=stride, relu=False)
    else:
        identity = x
    # conv3 + BN with fused residual-add + ReLU
    out = conv_bn_act(out, blk['c3']['w'], blk['c3']['s'], blk['c3']['b'],
                      relu=True, residual=identity)
    return out


def deeplabv3_resnet50_forward(params, x_nchw, num_classes=8):
    N, _, H, W_ = x_nchw.shape
    x = jnp.transpose(x_nchw, (0, 2, 3, 1)).astype(jnp.bfloat16)   # -> NHWC bf16

    # --- ResNet-50 backbone (output_stride=8: dilation in layer3/layer4) ---
    st = params['stem']
    x = conv_bn_act(x, st['w'], st['s'], st['b'], stride=2, padding=3, relu=True)
    x = maxpool_3x3_s2_p1(x)

    # (stride_block0, dilation_block0, dilation_rest) per stage
    layer_cfg = {'layer1': (1, 1, 1), 'layer2': (2, 1, 1),
                 'layer3': (1, 1, 2), 'layer4': (1, 2, 4)}
    for name in ('layer1', 'layer2', 'layer3', 'layer4'):
        stride0, dil0, dil_rest = layer_cfg[name]
        for bi, blk in enumerate(params[name]):
            if bi == 0:
                x = _bottleneck(x, blk, stride0, dil0)
            else:
                x = _bottleneck(x, blk, 1, dil_rest)
    feat = x                                   # (N, H/8, W/8, 2048)
    fh, fw = feat.shape[1], feat.shape[2]

    # --- ASPP (rates 12, 24, 36) ---
    a = params['aspp']
    branches = [conv_bn_act(feat, a['b0']['w'], a['b0']['s'], a['b0']['b'],
                            relu=True)]
    for bname, rate in (('b1', 12), ('b2', 24), ('b3', 36)):
        bp = a[bname]
        branches.append(conv_bn_act(feat, bp['w'], bp['s'], bp['b'],
                                    dilation=rate, padding=rate, relu=True))
    pooled = global_avg_pool(feat)                                   # (N,1,1,2048)
    pooled = conv_bn_act(pooled, a['pool']['w'], a['pool']['s'],
                         a['pool']['b'], relu=True)                  # (N,1,1,256)
    # bilinear upsample from a 1x1 source == exact broadcast
    branches.append(jnp.broadcast_to(pooled, (N, fh, fw, pooled.shape[-1])))
    y = jnp.concatenate(branches, axis=-1)                           # (N,fh,fw,1280)
    y = conv_bn_act(y, a['proj']['w'], a['proj']['s'], a['proj']['b'], relu=True)
    # TODO(synk): Dropout(p=0.5) after the ASPP projection is identity (eval mode).

    # --- DeepLab head tail ---
    hd = params['head']
    y = conv_bn_act(y, hd['conv']['w'], hd['conv']['s'], hd['conv']['b'],
                    padding=1, relu=True)
    y = conv_bn_act(y, hd['cls_w'], None, hd['cls_b'], relu=False,
                    out_dtype=jnp.float32)                           # 1x1 conv + bias

    # --- bilinear upsample to input size (align_corners=False), to NCHW ---
    y = bilinear_resize_to_nchw(y, H, W_)
    # forward() returns the raw segmentation dict; nn.Sigmoid is unused in forward.
    return {'out': y}


if __name__ == "__main__":
    key = jax.random.PRNGKey(0)
    pkey, xkey = jax.random.split(key)
    params = make_params(pkey, num_classes=8)
    x = jax.random.normal(xkey, (2, 3, 16, 16), jnp.float32)   # NCHW, like PyTorch
    out = deeplabv3_resnet50_forward(params, x, num_classes=8)
    result = jax.block_until_ready(out['out'])
    assert result.shape == (2, 8, 16, 16), result.shape
    assert bool(jnp.all(jnp.isfinite(result)))
    print("KERNEL_OK")
</pallas_src>

<mosaic_0001>
module attributes {stable_mosaic.version = 11 : i64} {
  func.func @_mm_fused_kernel(%arg0: i32, %arg1: i32, %arg2: i32, %arg3: memref<128x256xbf16, #tpu.memory_space<vmem>>, %arg4: memref<256x128xbf16, #tpu.memory_space<vmem>>, %arg5: memref<1x128xf32, #tpu.memory_space<vmem>>, %arg6: memref<1x128xf32, #tpu.memory_space<vmem>>, %arg7: memref<128x128xbf16, #tpu.memory_space<vmem>>, %arg8: memref<128x128xf32, #tpu.memory_space<vmem>>) attributes {dimension_semantics = [#tpu.dimension_semantics<parallel>, #tpu.dimension_semantics<parallel>, #tpu.dimension_semantics<arbitrary>], iteration_bounds = array<i64: 1, 1, 1>, scalar_prefetch = 0 : i64, scratch_operands = 1 : i64, tpu.core_type = #tpu.core_type<tc>, window_params = [{transform_indices = @transform_0, window_bounds = array<i64: 128, 256>}, {transform_indices = @transform_1, window_bounds = array<i64: 256, 128>}, {transform_indices = @transform_2, window_bounds = array<i64: 1, 128>}, {transform_indices = @transform_3, window_bounds = array<i64: 1, 128>}, {transform_indices = @transform_4, window_bounds = array<i64: 128, 128>}]} {
    %c0_i32 = arith.constant 0 : i32
    %0 = arith.cmpi eq, %arg2, %c0_i32 : i32
    %1 = arith.extui %0 : i1 to i32
    %c0_i32_0 = arith.constant 0 : i32
    %2 = arith.cmpi ne, %1, %c0_i32_0 : i32
    scf.if %2 {
      %cst_10 = arith.constant 0.000000e+00 : f32
      %12 = vector.broadcast %cst_10 : f32 to vector<128x128xf32>
      %c0_11 = arith.constant 0 : index
      %c0_12 = arith.constant 0 : index
      %13 = vector.load %arg8[%c0_11, %c0_12] : memref<128x128xf32, #tpu.memory_space<vmem>>, vector<128x128xf32>
      tpu.vector_store %arg8[%c0_11, %c0_12], %12 {strides = array<i32>} : memref<128x128xf32, #tpu.memory_space<vmem>>, vector<128x128xf32>,
    } else {
    }
    %c0 = arith.constant 0 : index
    %c0_1 = arith.constant 0 : index
    %3 = vector.load %arg8[%c0, %c0_1] : memref<128x128xf32, #tpu.memory_space<vmem>>, vector<128x128xf32>
    %c0_2 = arith.constant 0 : index
    %c0_3 = arith.constant 0 : index
    %4 = vector.load %arg3[%c0_2, %c0_3] : memref<128x256xbf16, #tpu.memory_space<vmem>>, vector<128x256xbf16>
    %c0_4 = arith.constant 0 : index
    %c0_5 = arith.constant 0 : index
    %5 = vector.load %arg4[%c0_4, %c0_5] : memref<256x128xbf16, #tpu.memory_space<vmem>>, vector<256x128xbf16>
    %cst = arith.constant dense<0.000000e+00> : vector<128x128xf32>
    %6 = tpu.matmul %4, %5, %cst {dimension_numbers = #tpu.dot_dimension_numbers<[1], [0], [0], [1], [0, 0, 1, 1], [], []>} : vector<128x256xbf16>, vector<256x128xbf16>, vector<128x128xf32> -> vector<128x128xf32>
    %7 = arith.addf %3, %6 : vector<128x128xf32>
    %c0_6 = arith.constant 0 : index
    %c0_7 = arith.constant 0 : index
    %8 = vector.load %arg8[%c0_6, %c0_7] : memref<128x128xf32, #tpu.memory_space<vmem>>, vector<128x128xf32>
    tpu.vector_store %arg8[%c0_6, %c0_7], %7 {strides = array<i32>} : memref<128x128xf32, #tpu.memory_space<vmem>>, vector<128x128xf32>,
    %c0_i32_8 = arith.constant 0 : i32
    %9 = arith.cmpi eq, %arg2, %c0_i32_8 : i32
    %10 = arith.extui %9 : i1 to i32
    %c0_i32_9 = arith.constant 0 : i32
    %11 = arith.cmpi ne, %10, %c0_i32_9 : i32
    scf.if %11 {
      %c0_10 = arith.constant 0 : index
      %c0_11 = arith.constant 0 : index
      %12 = vector.load %arg8[%c0_10, %c0_11] : memref<128x128xf32, #tpu.memory_space<vmem>>, vector<128x128xf32>
      %c0_12 = arith.constant 0 : index
      %c0_13 = arith.constant 0 : index
      %13 = vector.load %arg5[%c0_12, %c0_13] : memref<1x128xf32, #tpu.memory_space<vmem>>, vector<1x128xf32>
      %14 = vector.broadcast %13 : vector<1x128xf32> to vector<128x128xf32>
      %15 = arith.mulf %12, %14 : vector<128x128xf32>
      %c0_14 = arith.constant 0 : index
      %c0_15 = arith.constant 0 : index
      %16 = vector.load %arg6[%c0_14, %c0_15] : memref<1x128xf32, #tpu.memory_space<vmem>>, vector<1x128xf32>
      %17 = vector.broadcast %16 : vector<1x128xf32> to vector<128x128xf32>
      %18 = arith.addf %15, %17 : vector<128x128xf32>
      %cst_16 = arith.constant 0.000000e+00 : f32
      %19 = vector.broadcast %cst_16 : f32 to vector<128x128xf32>
      %20 = arith.maximumf %18, %19 : vector<128x128xf32>
      %21 = arith.truncf %20 : vector<128x128xf32> to vector<128x128xbf16>
      %c0_17 = arith.constant 0 : index
      %c0_18 = arith.constant 0 : index
      %22 = vector.load %arg7[%c0_17, %c0_18] : memref<128x128xbf16, #tpu.memory_space<vmem>>, vector<128x128xbf16>
      tpu.vector_store %arg7[%c0_17, %c0_18], %21 {strides = array<i32>} : memref<128x128xbf16, #tpu.memory_space<vmem>>, vector<128x128xbf16>,
    } else {
    }
    return
  }
  func.func @transform_0(%arg0: i32, %arg1: i32, %arg2: i32) -> (i32, i32) {
    %c0_i32 = arith.constant 0 : i32
    return %arg0, %arg2 : i32, i32
  }
  func.func @transform_1(%arg0: i32, %arg1: i32, %arg2: i32) -> (i32, i32) {
    %c0_i32 = arith.constant 0 : i32
    return %arg2, %arg1 : i32, i32
  }
  func.func @transform_2(%arg0: i32, %arg1: i32, %arg2: i32) -> (i32, i32) {
    %c0_i32 = arith.constant 0 : i32
    %c0_i32_0 = arith.constant 0 : i32
    return %c0_i32, %arg1 : i32, i32
  }
  func.func @transform_3(%arg0: i32, %arg1: i32, %arg2: i32) -> (i32, i32) {
    %c0_i32 = arith.constant 0 : i32
    %c0_i32_0 = arith.constant 0 : i32
    return %c0_i32, %arg1 : i32, i32
  }
  func.func @transform_4(%arg0: i32, %arg1: i32, %arg2: i32) -> (i32, i32) {
    %c0_i32 = arith.constant 0 : i32
    return %arg0, %arg1 : i32, i32
  }
}

</mosaic_0001>

<bundles_post_ra>
// kernel: tpu_custom_call.1
= control target key start
LH: loop header
LB: loop body
LE: loop exit
PB: predicated region body
PF: predicated region fallthrough
CT: control target
= control target key end

     0   :  { %9 = vsyncpa [#allocation4], 0  ;;  %s1010_s0 = inlined_call_operand.hbm [shape: bf16[128,256], index: 0, kind: input, shape index: {}]   ;;  %s1011_s1 = inlined_call_operand.hbm [shape: bf16[256,128], index: 1, kind: input, shape index: {}]   ;;  %s1012_s2 = inlined_call_operand.vmem [shape: f32[1,128], index: 2, kind: input, shape index: {}]   ;;  %s1013_s3 = inlined_call_operand.vmem [shape: f32[1,128], index: 3, kind: input, shape index: {}]   ;;  %s1014_s4 = inlined_call_operand.hbm [shape: bf16[128,128], index: 4, kind: output, shape index: {}]  }
   0x1   :  { %10 = vsyncpa [#allocation7], 0 }
   0x2   :  { %11 = vsyncpa [#allocation5], 0  ;;  %s921_s15 = smov [#allocation3]  }
   0x3   :  { %s17_s16 = sshll.u32 %s921_s15, 4  ;;  %s18_s16 = int_to_ptr.vmem [resolvable:$true] %s17_s16 }
   0x4   :  { %s863_s17 = scalar_lea.vmem %s18_s16, 2048  ;;  %p868_p1 = scmp.lt.s32.totalorder %s18_s16, %s18_s16 }
   0x5   :  { %p864_p0 = scmp.ne.s32.totalorder %s18_s16, %s863_s17  ;;  %p869_p2 = scmp.lt.s32.totalorder %s863_s17, %s863_s17 }
   0x7   :  { %p870_p3 = por %p869_p2, %p868_p1 }
   0x9   :  { %p871_p4 = pnand %p870_p3, %p864_p0 }
   0xb   :  { %874 = shalt.err (!%p871_p4)
}
   0xc   :  { %s922_s18 = smov 128   ;;  %s923_s19 = smov 8  }
   0xd   :  { %23 = dma.hbm_to_vmem [thread:$0]  %s1010_s0, 2048, %s18_s16, [#allocation4], %s922_s18, %s922_s18, %s923_s19  }
   0xe   :  { %s924_s22 = smov [#allocation6]  }
   0xf   :  { %s29_s23 = sshll.u32 %s924_s22, 4  ;;  %s30_s23 = int_to_ptr.vmem [resolvable:$true] %s29_s23 }
  0x10   :  { %s883_s24 = scalar_lea.vmem %s30_s23, 2048  ;;  %p888_p6 = scmp.lt.s32.totalorder %s30_s23, %s30_s23 }
  0x11   :  { %p884_p5 = scmp.ne.s32.totalorder %s30_s23, %s883_s24  ;;  %p889_p7 = scmp.lt.s32.totalorder %s883_s24, %s883_s24 }
  0x13   :  { %p890_p8 = por %p889_p7, %p888_p6 }
  0x15   :  { %p891_p9 = pnand %p890_p8, %p884_p5 }
  0x17   :  { %894 = shalt.err (!%p891_p9)
}
  0x18   :  { %s925_s25 = smov 64   ;;  %s926_s26 = smov 4  }
  0x19   :  { %35 = dma.hbm_to_vmem [thread:$0]  %s1011_s1, 2048, %s30_s23, [#allocation7], %s925_s25, %s925_s25, %s926_s26  }
  0x1a   :  { %915 = dma.done.wait [#allocation4], 2048  }
  0x1b   :  { %916 = vsyncadd [#allocation4], 4294965248 }
  0x1c   :  { %917 = dma.done.wait [#allocation7], 2048  }
  0x1d   :  { %918 = vsyncadd [#allocation7], 4294965248  ;;  %v815_v0 = vld [vmem:[#allocation6 + $0x78] sm:$0xff]   ;;  %v817_v2 = vld [vmem:[#allocation6 + $0x70] sm:$0xff]  }
  0x1e   :  { %v816_v1 = vld [vmem:[#allocation6 + $0x38] sm:$0xff]   ;;  %728 = vmatprep.subr.bf16.mxu0 %v815_v0  ;;  %792 = vmatprep.subr.bf16.mxu1 %v815_v0  ;;  %v818_v3 = vld [vmem:[#allocation6 + $0x30] sm:$0xff]   ;;  %v819_v4 = vld [vmem:[#allocation6 + $0x68] sm:$0xff]  }
  0x1f   :  { %729 = vmatpush3.bf16.msra.mxu0 %v816_v1  ;;  %800 = vmatpush3.bf16.msra.mxu1 %v816_v1  ;;  %v820_v5 = vld [vmem:[#allocation6 + $0x28] sm:$0xff]   ;;  %v821_v6 = vld [vmem:[#allocation6 + $0x60] sm:$0xff]   ;;  %v823_v8 = vld [vmem:[#allocation6 + $0x58] sm:$0xff]  }
  0x20   :  { %730 = vmatprep.subr.bf16.mxu0 %v817_v2  ;;  %793 = vmatprep.subr.bf16.mxu1 %v817_v2  ;;  %v822_v7 = vld [vmem:[#allocation6 + $0x20] sm:$0xff]   ;;  %v824_v9 = vld [vmem:[#allocation6 + $0x18] sm:$0xff]   ;;  %v825_v10 = vld [vmem:[#allocation6 + $0x50] sm:$0xff]  }
  0x21   :  { %v833_v11 = vld [vmem:[#allocation3 + $0x4] ss:$8 sps:$4 sm:$0xff]   ;;  %v826_v13 = vld [vmem:[#allocation6 + $0x10] sm:$0xff]   ;;  %v831_v18 = vld [vmem:[#allocation3] ss:$8 sps:$4 sm:$0xff]  }
  0x22   :  { %v836_v12 = vld [vmem:[#allocation3 + $0x44] ss:$8 sps:$4 sm:$0xff]   ;;  %339 = vmatprep.mubr.bf16.mxu0 %v833_v11  ;;  %v834_v19 = vld [vmem:[#allocation3 + $0x40] ss:$8 sps:$4 sm:$0xff]   ;;  %v837_v20 = vld [vmem:[#allocation3 + $0x14] ss:$8 sps:$4 sm:$0xff]  }
  0x23   :  { %731 = vmatpush3.bf16.msra.mxu0 %v818_v3  ;;  %801 = vmatpush3.bf16.msra.mxu1 %v818_v3  ;;  %v827_v14 = vld [vmem:[#allocation6 + $0x48] sm:$0xff]   ;;  %v829_v16 = vld [vmem:[#allocation6 + $0x40] sm:$0xff]   ;;  %v839_v21 = vld [vmem:[#allocation3 + $0x54] ss:$8 sps:$4 sm:$0xff]  }
  0x24   :  { %732 = vmatprep.subr.bf16.mxu0 %v819_v4  ;;  %794 = vmatprep.subr.bf16.mxu1 %v819_v4  ;;  %v828_v15 = vld [vmem:[#allocation6 + $0x8] sm:$0xff]   ;;  %v830_v17 = vld [vmem:[#allocation6] sm:$0xff]   ;;  %v841_v22 = vld [vmem:[#allocation3 + $0x10] ss:$8 sps:$4 sm:$0xff]  }
  0x25   :  { %371 = vmatprep.mubr.bf16.mxu1 %v836_v12  ;;  %v842_v23 = vld [vmem:[#allocation3 + $0x50] ss:$8 sps:$4 sm:$0xff]   ;;  %v843_v24 = vld [vmem:[#allocation3 + $0x24] ss:$8 sps:$4 sm:$0xff]   ;;  %v847_v26 = vld [vmem:[#allocation3 + $0x20] ss:$8 sps:$4 sm:$0xff]  }
  0x26   :  { %v845_v25 = vld [vmem:[#allocation3 + $0x64] ss:$8 sps:$4 sm:$0xff]   ;;  %v848_v27 = vld [vmem:[#allocation3 + $0x60] ss:$8 sps:$4 sm:$0xff]   ;;  %v849_v28 = vld [vmem:[#allocation3 + $0x34] ss:$8 sps:$4 sm:$0xff]  }
  0x27   :  { %733 = vmatpush3.bf16.msra.mxu0 %v820_v5  ;;  %802 = vmatpush3.bf16.msra.mxu1 %v820_v5  ;;  %v851_v29 = vld [vmem:[#allocation3 + $0x74] ss:$8 sps:$4 sm:$0xff]   ;;  %v853_v30 = vld [vmem:[#allocation3 + $0x30] ss:$8 sps:$4 sm:$0xff]   ;;  %v965_v35 = vld [vmem:[%s1012_s2] ss:$0 sm:$0xff] }
  0x28   :  { %734 = vmatprep.subr.bf16.mxu0 %v821_v6  ;;  %795 = vmatprep.subr.bf16.mxu1 %v821_v6  ;;  %v854_v31 = vld [vmem:[#allocation3 + $0x70] ss:$8 sps:$4 sm:$0xff]   ;;  %v972_v43 = vld [vmem:[%s1013_s3] ss:$0 sm:$0xff]  ;;  %s927_s2 = smov [#allocation8]  }
  0x29   :  { %s602_s3 = sshll.u32 %s927_s2, 4  ;;  %s603_s3 = int_to_ptr.vmem [resolvable:$true] %s602_s3 }
  0x2a   :  { %s895_s5 = scalar_lea.vmem %s603_s3, 1024  ;;  %p900_p11 = scmp.lt.s32.totalorder %s603_s3, %s603_s3 }
  0x2b   :  { %735 = vmatpush3.bf16.msra.mxu0 %v822_v7  ;;  %803 = vmatpush3.bf16.msra.mxu1 %v822_v7  ;;  %p896_p10 = scmp.ne.s32.totalorder %s603_s3, %s895_s5  ;;  %p901_p12 = scmp.lt.s32.totalorder %s895_s5, %s895_s5 }
  0x2c   :  { %736 = vmatprep.subr.bf16.mxu0 %v823_v8  ;;  %796 = vmatprep.subr.bf16.mxu1 %v823_v8 }
  0x2d   :  { %p902_p13 = por %p901_p12, %p900_p11 }
  0x2f   :  { %737 = vmatpush3.bf16.msra.mxu0 %v824_v9  ;;  %804 = vmatpush3.bf16.msra.mxu1 %v824_v9  ;;  %p903_p0 = pnand %p902_p13, %p896_p10 }
  0x30   :  { %738 = vmatprep.subr.bf16.mxu0 %v825_v10  ;;  %797 = vmatprep.subr.bf16.mxu1 %v825_v10 }
  0x33   :  { %739 = vmatpush3.bf16.msra.mxu0 %v826_v13  ;;  %805 = vmatpush3.bf16.msra.mxu1 %v826_v13 }
  0x34   :  { %740 = vmatprep.subr.bf16.mxu0 %v827_v14  ;;  %798 = vmatprep.subr.bf16.mxu1 %v827_v14 }
  0x37   :  { %741 = vmatpush3.bf16.msra.mxu0 %v828_v15  ;;  %806 = vmatpush3.bf16.msra.mxu1 %v828_v15 }
  0x38   :  { %742 = vmatprep.subr.bf16.mxu0 %v829_v16  ;;  %799 = vmatprep.subr.bf16.mxu1 %v829_v16 }
  0x3b   :  { %743 = vmatpush3.bf16.msra.mxu0 %v830_v17  ;;  %807 = vmatpush3.bf16.msra.mxu1 %v830_v17 }
  0x3e   :  { %340 = vmatmul.mubr.bf16.vlgmr.msra.gmra.mxu0 %v831_v18  ;;  %372 = vmatmul.mubr.bf16.vlgmr.msra.gmra.mxu1 %v834_v19 }
  0x3f   :  { %347 = vmatprep.mubr.bf16.mxu0 %v837_v20  ;;  %379 = vmatprep.mubr.bf16.mxu1 %v839_v21 }
  0x46   :  { %348 = vmatmul.mubr.bf16.gmra.mxu0 %v841_v22  ;;  %380 = vmatmul.mubr.bf16.gmra.mxu1 %v842_v23 }
  0x47   :  { %355 = vmatprep.mubr.bf16.mxu0 %v843_v24  ;;  %387 = vmatprep.mubr.bf16.mxu1 %v845_v25 }
  0x4e   :  { %356 = vmatmul.mubr.bf16.gmra.mxu0 %v847_v26  ;;  %388 = vmatmul.mubr.bf16.gmra.mxu1 %v848_v27 }
  0x4f   :  { %363 = vmatprep.mubr.bf16.mxu0 %v849_v28  ;;  %395 = vmatprep.mubr.bf16.mxu1 %v851_v29 }
  0x56   :  { %364 = vmatmul.mubr.bf16.gmra.mxu0 %v853_v30  ;;  %396 = vmatmul.mubr.bf16.gmra.mxu1 %v854_v31 }
  0xfe   :  { %v744_v32 = vpop.f32.mrf.mxu0  ;;  %v768_v33 = vpop.f32.mrf.mxu1 }
 0x100   :  { %v745_v34 = vpop.f32.mrf.mxu0  ;;  %v769_v36 = vpop.f32.mrf.mxu1 }
 0x101   :  { %v746_v37 = vadd.f32 %v745_v34, %v744_v32  ;;  %v770_v38 = vadd.f32 %v769_v36, %v768_v33 }
 0x102   :  { %v747_v39 = vpop.f32.mrf.mxu0  ;;  %v771_v40 = vpop.f32.mrf.mxu1 }
 0x103   :  { %v462_v41 = vmul.f32 %v746_v37, %v965_v35  ;;  %v470_v42 = vmul.f32 %v770_v38, %v965_v35 }
 0x104   :  { %v748_v44 = vpop.f32.mrf.mxu0  ;;  %v772_v45 = vpop.f32.mrf.mxu1 }
 0x105   :  { %v749_v46 = vadd.f32 %v748_v44, %v747_v39  ;;  %v773_v47 = vadd.f32 %v772_v45, %v771_v40  ;;  %v485_v50 = vadd.f32 %v972_v43, %v462_v41  ;;  %v493_v51 = vadd.f32 %v972_v43, %v470_v42 }
 0x106   :  { %v750_v48 = vpop.f32.mrf.mxu0  ;;  %v774_v49 = vpop.f32.mrf.mxu1 }
 0x107   :  { %v463_v52 = vmul.f32 %v749_v46, %v965_v35  ;;  %v471_v53 = vmul.f32 %v773_v47, %v965_v35  ;;  %v501_v62 = vmax.f32 %v485_v50, 0.0  ;;  %v509_v63 = vmax.f32 %v493_v51, 0.0 }
 0x108   :  { %v751_v54 = vpop.f32.mrf.mxu0  ;;  %v775_v55 = vpop.f32.mrf.mxu1 }
 0x109   :  { %v486_v56 = vadd.f32 %v972_v43, %v463_v52  ;;  %v494_v57 = vadd.f32 %v972_v43, %v471_v53  ;;  %v752_v58 = vadd.f32 %v751_v54, %v750_v48  ;;  %v776_v59 = vadd.f32 %v775_v55, %v774_v49 }
 0x10a   :  { %v753_v60 = vpop.f32.mrf.mxu0  ;;  %v777_v61 = vpop.f32.mrf.mxu1 }
 0x10b   :  { %v502_v0 = vmax.f32 %v486_v56, 0.0  ;;  %v510_v1 = vmax.f32 %v494_v57, 0.0  ;;  %v464_v2 = vmul.f32 %v752_v58, %v965_v35  ;;  %v472_v3 = vmul.f32 %v776_v59, %v965_v35 }
 0x10c   :  { %v754_v4 = vpop.f32.mrf.mxu0  ;;  %v778_v5 = vpop.f32.mrf.mxu1 }
 0x10d   :  { %v684_v6 = vpack.c.bf16 %v502_v0, %v501_v62  ;;  %v704_v7 = vpack.c.bf16 %v510_v1, %v509_v63  ;;  %v755_v8 = vadd.f32 %v754_v4, %v753_v60  ;;  %v779_v9 = vadd.f32 %v778_v5, %v777_v61 }
 0x10e   :  { %v756_v10 = vpop.f32.mrf.mxu0  ;;  %v780_v11 = vpop.f32.mrf.mxu1  ;;  %v487_v12 = vadd.f32 %v972_v43, %v464_v2  ;;  %v495_v13 = vadd.f32 %v972_v43, %v472_v3 }
 0x10f   :  { %685 = vst [vmem:[#allocation8] sm:$0xff] %v684_v6   ;;  %724 = vst [vmem:[#allocation8 + $0x20] sm:$0xff] %v704_v7   ;;  %v465_v14 = vmul.f32 %v755_v8, %v965_v35  ;;  %v473_v15 = vmul.f32 %v779_v9, %v965_v35 }
 0x110   :  { %v757_v16 = vpop.f32.mrf.mxu0  ;;  %v781_v17 = vpop.f32.mrf.mxu1  ;;  %v503_v26 = vmax.f32 %v487_v12, 0.0  ;;  %v511_v27 = vmax.f32 %v495_v13, 0.0 }
 0x111   :  { %v758_v18 = vadd.f32 %v757_v16, %v756_v10  ;;  %v782_v19 = vadd.f32 %v781_v17, %v780_v11  ;;  %v488_v20 = vadd.f32 %v972_v43, %v465_v14  ;;  %v496_v21 = vadd.f32 %v972_v43, %v473_v15 }
 0x112   :  { %v759_v22 = vpop.f32.mrf.mxu0  ;;  %v783_v23 = vpop.f32.mrf.mxu1 }
 0x113   :  { %v466_v24 = vmul.f32 %v758_v18, %v965_v35  ;;  %v474_v25 = vmul.f32 %v782_v19, %v965_v35  ;;  %v504_v28 = vmax.f32 %v488_v20, 0.0  ;;  %v512_v29 = vmax.f32 %v496_v21, 0.0 }
 0x114   :  { %v760_v30 = vpop.f32.mrf.mxu0  ;;  %v784_v31 = vpop.f32.mrf.mxu1 }
 0x115   :  { %v761_v32 = vadd.f32 %v760_v30, %v759_v22  ;;  %v785_v33 = vadd.f32 %v784_v31, %v783_v23  ;;  %v689_v34 = vpack.c.bf16 %v504_v28, %v503_v26  ;;  %v709_v36 = vpack.c.bf16 %v512_v29, %v511_v27 }
 0x116   :  { %v762_v37 = vpop.f32.mrf.mxu0  ;;  %v786_v38 = vpop.f32.mrf.mxu1  ;;  %v489_v39 = vadd.f32 %v972_v43, %v466_v24  ;;  %v497_v40 = vadd.f32 %v972_v43, %v474_v25 }
 0x117   :  { %v467_v41 = vmul.f32 %v761_v32, %v965_v35  ;;  %v475_v42 = vmul.f32 %v785_v33, %v965_v35  ;;  %721 = vst [vmem:[#allocation8 + $0x8] sm:$0xff] %v689_v34   ;;  %725 = vst [vmem:[#allocation8 + $0x28] sm:$0xff] %v709_v36  }
 0x118   :  { %v763_v44 = vpop.f32.mrf.mxu0  ;;  %v787_v45 = vpop.f32.mrf.mxu1  ;;  %v505_v52 = vmax.f32 %v489_v39, 0.0  ;;  %v513_v53 = vmax.f32 %v497_v40, 0.0 }
 0x119   :  { %v490_v46 = vadd.f32 %v972_v43, %v467_v41  ;;  %v498_v47 = vadd.f32 %v972_v43, %v475_v42  ;;  %v764_v48 = vadd.f32 %v763_v44, %v762_v37  ;;  %v788_v49 = vadd.f32 %v787_v45, %v786_v38 }
 0x11a   :  { %v765_v50 = vpop.f32.mrf.mxu0  ;;  %v789_v51 = vpop.f32.mrf.mxu1 }
 0x11b   :  { %v506_v54 = vmax.f32 %v490_v46, 0.0  ;;  %v514_v55 = vmax.f32 %v498_v47, 0.0  ;;  %v468_v56 = vmul.f32 %v764_v48, %v965_v35  ;;  %v476_v57 = vmul.f32 %v788_v49, %v965_v35 }
 0x11c   :  { %v766_v58 = vpop.f32.mrf.mxu0  ;;  %v790_v59 = vpop.f32.mrf.mxu1 }
 0x11d   :  { %v694_v60 = vpack.c.bf16 %v506_v54, %v505_v52  ;;  %v714_v61 = vpack.c.bf16 %v514_v55, %v513_v53  ;;  %v767_v62 = vadd.f32 %v766_v58, %v765_v50  ;;  %v791_v63 = vadd.f32 %v790_v59, %v789_v51 }
 0x11e   :  { %v491_v0 = vadd.f32 %v972_v43, %v468_v56  ;;  %v499_v1 = vadd.f32 %v972_v43, %v476_v57 }
 0x11f   :  { %722 = vst [vmem:[#allocation8 + $0x10] sm:$0xff] %v694_v60   ;;  %726 = vst [vmem:[#allocation8 + $0x30] sm:$0xff] %v714_v61   ;;  %v469_v2 = vmul.f32 %v767_v62, %v965_v35  ;;  %v477_v3 = vmul.f32 %v791_v63, %v965_v35 }
 0x120   :  { %v507_v6 = vmax.f32 %v491_v0, 0.0  ;;  %v515_v7 = vmax.f32 %v499_v1, 0.0 }
 0x121   :  { %v492_v4 = vadd.f32 %v972_v43, %v469_v2  ;;  %v500_v5 = vadd.f32 %v972_v43, %v477_v3 }
 0x123   :  { %v508_v8 = vmax.f32 %v492_v4, 0.0  ;;  %v516_v9 = vmax.f32 %v500_v5, 0.0 }
 0x125   :  { %v699_v10 = vpack.c.bf16 %v508_v8, %v507_v6  ;;  %v719_v11 = vpack.c.bf16 %v516_v9, %v515_v7 }
 0x127   :  { %723 = vst [vmem:[#allocation8 + $0x18] sm:$0xff] %v699_v10   ;;  %727 = vst [vmem:[#allocation8 + $0x38] sm:$0xff] %v719_v11  }
 0x128   :  { %906 = shalt.err (!%p903_p0)
}
 0x129   :  { %608 = dma.vmem_to_hbm [thread:$0]  %s603_s3, 1024, %s1014_s4, [#allocation5], %s925_s25, %s925_s25, %s926_s26  }
 0x12a   :  { %919 = dma.done.wait [#allocation5], 1024  }
 0x12b   :  { %920 = vsyncadd [#allocation5], 4294966272 }
 0x12c   :  { %612 = vsyncpa [#allocation4], 1 }
 0x12d   :  { %613 = vsyncpa [#allocation7], 1 }
 0x12e   :  { %614 = vsyncpa [#allocation5], 1 }

</bundles_post_ra>
